<compile_context>
chip_gen: v7x
topology: tpu7x:2x2x1
jax: 0.10.0
libtpu: 0.0.40
codegen_flags: <defaults>
</compile_context>

<pallas_src>
import jax
import jax.numpy as jnp
from jax.experimental import pallas as pl
from jax.experimental.pallas import tpu as pltpu


def _conv1x1_pixel_major_kernel(x_ref, w_ref, b_ref, o_ref):
    # x_ref: (C_in, T)      lane-dense spatial tile of one image (NCHW view)
    # w_ref: (C_in, C_out)  resident weight (transposed once in the wrapper)
    # b_ref: (1, C_out)     resident bias
    # o_ref: (T, C_out)     pixel-major output tile (permute fused here)
    acc = jax.lax.dot_general(
        x_ref[...], w_ref[...],
        dimension_numbers=(((0,), (0,)), ((), ())),   # contract channel dim
        preferred_element_type=jnp.float32,
    )
    o_ref[...] = (acc + b_ref[...]).astype(o_ref.dtype)


def _round_up(a, m):
    return ((a + m - 1) // m) * m


def landmark_head_forward(x_nchw, weight, bias, num_anchors=3, tile_hw=16384):
    """x_nchw: (N, C_in, H, W); weight: (C_out, C_in, 1, 1); bias: (C_out,).

    Returns (N, H*W*num_anchors, 10), matching the PyTorch module semantics.
    """
    N, C_in, H, W = x_nchw.shape
    C_out = weight.shape[0]
    assert C_out == num_anchors * 10
    HW = H * W

    # Pure views / tiny reshapes — no data movement of the large input.
    x = x_nchw.reshape(N, C_in, HW)
    w_t = weight.reshape(C_out, C_in).T          # (C_in, C_out), tiny one-off
    b = bias.reshape(1, C_out)

    # Lane-dense spatial tile: multiple of 128, capped near HW so small FPN
    # levels don't over-allocate.  Remainder tiles are handled by the cdiv
    # grid (OOB input columns padded, OOB output rows masked on store).
    tile_hw = min(_round_up(tile_hw, 128), _round_up(HW, 128))
    # v7x megacore: keep >= 2 "parallel" grid steps when a single image would
    # otherwise collapse the whole grid to one iteration.
    if N * pl.cdiv(HW, tile_hw) < 2 and HW > 128:
        tile_hw = _round_up(pl.cdiv(HW, 2), 128)

    grid = (N, pl.cdiv(HW, tile_hw))

    itemsize = jnp.dtype(x.dtype).itemsize
    cost = pl.CostEstimate(
        flops=2 * N * HW * C_in * C_out,
        transcendentals=0,
        bytes_accessed=N * HW * (C_in + C_out) * itemsize
        + (C_in * C_out + C_out) * jnp.dtype(weight.dtype).itemsize,
    )

    out_pm = pl.pallas_call(
        _conv1x1_pixel_major_kernel,
        out_shape=jax.ShapeDtypeStruct((N, HW, C_out), x.dtype),
        grid=grid,
        in_specs=[
            # (None, C_in, tile_hw): batch dim squeezed; kernel sees (C_in, T).
            pl.BlockSpec((None, C_in, tile_hw), lambda n, j: (n, 0, j)),
            # Weight / bias resident in VMEM across the whole grid.
            pl.BlockSpec((C_in, C_out), lambda n, j: (0, 0)),
            pl.BlockSpec((1, C_out), lambda n, j: (0, 0)),
        ],
        out_specs=pl.BlockSpec((None, tile_hw, C_out), lambda n, j: (n, j, 0)),
        compiler_params=pltpu.CompilerParams(
            dimension_semantics=("parallel", "parallel"),
            vmem_limit_bytes=32 * 1024 * 1024,
        ),
        cost_estimate=cost,
    )(x, w_t, b)

    # (N, HW, A*10) -> (N, HW*A, 10): contiguous regroup, no HBM pass.
    return out_pm.reshape(N, HW * num_anchors, 10)


def _reference(x, weight, bias, num_anchors):
    N, C_in, H, W = x.shape
    C_out = weight.shape[0]
    ref = jnp.einsum("nchw,oc->nhwo", x, weight.reshape(C_out, C_in)) + bias
    return ref.reshape(N, H * W * num_anchors, 10)


if __name__ == "__main__":
    key = jax.random.PRNGKey(0)
    num_anchors = 3
    C_out = num_anchors * 10

    # Main case, a forced-split / remainder case (HW % tile != 0), and a tiny
    # HW < 128 case to lock in masked remainder behaviour.
    cases = [(2, 32, 16, 16), (1, 32, 20, 20), (1, 32, 9, 9)]
    for (N, C_in, H, W) in cases:
        k_x, k_w, k_b, key = jax.random.split(key, 4)
        x = jax.random.normal(k_x, (N, C_in, H, W), dtype=jnp.float32)
        weight = jax.random.normal(k_w, (C_out, C_in, 1, 1), dtype=jnp.float32) * 0.05
        bias = jax.random.normal(k_b, (C_out,), dtype=jnp.float32) * 0.01

        out = landmark_head_forward(x, weight, bias, num_anchors=num_anchors)
        out = jax.block_until_ready(out)
        ref = _reference(x, weight, bias, num_anchors)

        assert out.shape == (N, H * W * num_anchors, 10), out.shape
        assert jnp.allclose(out, ref, atol=1e-4, rtol=1e-4), (
            f"mismatch vs reference for input shape {(N, C_in, H, W)}")

    print("KERNEL_OK")
</pallas_src>

<mosaic_0001>
module attributes {stable_mosaic.version = 11 : i64} {
  func.func @_conv1x1_pixel_major_kernel(%arg0: i32, %arg1: i32, %arg2: memref<1x32x256xf32, #tpu.memory_space<vmem>>, %arg3: memref<32x30xf32, #tpu.memory_space<vmem>>, %arg4: memref<1x30xf32, #tpu.memory_space<vmem>>, %arg5: memref<1x256x30xf32, #tpu.memory_space<vmem>>) attributes {dimension_semantics = [#tpu.dimension_semantics<parallel>, #tpu.dimension_semantics<parallel>], iteration_bounds = array<i64: 2, 1>, scalar_prefetch = 0 : i64, scratch_operands = 0 : i64, tpu.core_type = #tpu.core_type<tc>, window_params = [{transform_indices = @transform_0, window_bounds = array<i64: 1, 32, 256>}, {pipeline_mode = #tpu.pipeline_mode<synchronous>, transform_indices = @transform_1, window_bounds = array<i64: 32, 30>}, {pipeline_mode = #tpu.pipeline_mode<synchronous>, transform_indices = @transform_2, window_bounds = array<i64: 1, 30>}, {transform_indices = @transform_3, window_bounds = array<i64: 1, 256, 30>}]} {
    %c0 = arith.constant 0 : index
    %c0_0 = arith.constant 0 : index
    %c0_1 = arith.constant 0 : index
    %0 = vector.load %arg2[%c0, %c0_0, %c0_1] : memref<1x32x256xf32, #tpu.memory_space<vmem>>, vector<1x32x256xf32>
    %1 = vector.shape_cast %0 : vector<1x32x256xf32> to vector<32x256xf32>
    %c0_2 = arith.constant 0 : index
    %c0_3 = arith.constant 0 : index
    %2 = vector.load %arg3[%c0_2, %c0_3] : memref<32x30xf32, #tpu.memory_space<vmem>>, vector<32x30xf32>
    %cst = arith.constant dense<0.000000e+00> : vector<256x30xf32>
    %3 = tpu.matmul %1, %2, %cst {dimension_numbers = #tpu.dot_dimension_numbers<[0], [0], [1], [1], [0, 1, 1, 1], [], []>} : vector<32x256xf32>, vector<32x30xf32>, vector<256x30xf32> -> vector<256x30xf32>
    %c0_4 = arith.constant 0 : index
    %c0_5 = arith.constant 0 : index
    %4 = vector.load %arg4[%c0_4, %c0_5] : memref<1x30xf32, #tpu.memory_space<vmem>>, vector<1x30xf32>
    %5 = vector.broadcast %4 : vector<1x30xf32> to vector<256x30xf32>
    %6 = arith.addf %3, %5 : vector<256x30xf32>
    %c0_6 = arith.constant 0 : index
    %c0_7 = arith.constant 0 : index
    %c0_8 = arith.constant 0 : index
    %7 = vector.load %arg5[%c0_6, %c0_7, %c0_8] : memref<1x256x30xf32, #tpu.memory_space<vmem>>, vector<1x256x30xf32>
    %8 = vector.shape_cast %7 : vector<1x256x30xf32> to vector<256x30xf32>
    %9 = vector.shape_cast %6 : vector<256x30xf32> to vector<1x256x30xf32>
    tpu.vector_store %arg5[%c0_6, %c0_7, %c0_8], %9 {strides = array<i32>} : memref<1x256x30xf32, #tpu.memory_space<vmem>>, vector<1x256x30xf32>,
    return
  }
  func.func @transform_0(%arg0: i32, %arg1: i32) -> (i32, i32, i32) {
    %c0_i32 = arith.constant 0 : i32
    %c0_i32_0 = arith.constant 0 : i32
    return %arg0, %c0_i32, %arg1 : i32, i32, i32
  }
  func.func @transform_1(%arg0: i32, %arg1: i32) -> (i32, i32) {
    %c0_i32 = arith.constant 0 : i32
    %c0_i32_0 = arith.constant 0 : i32
    %c0_i32_1 = arith.constant 0 : i32
    return %c0_i32, %c0_i32_0 : i32, i32
  }
  func.func @transform_2(%arg0: i32, %arg1: i32) -> (i32, i32) {
    %c0_i32 = arith.constant 0 : i32
    %c0_i32_0 = arith.constant 0 : i32
    %c0_i32_1 = arith.constant 0 : i32
    return %c0_i32, %c0_i32_0 : i32, i32
  }
  func.func @transform_3(%arg0: i32, %arg1: i32) -> (i32, i32, i32) {
    %c0_i32 = arith.constant 0 : i32
    %c0_i32_0 = arith.constant 0 : i32
    return %arg0, %arg1, %c0_i32 : i32, i32, i32
  }
}

</mosaic_0001>

<bundles_post_ra>
// kernel: tpu_custom_call.1
= control target key start
LH: loop header
LB: loop body
LE: loop exit
PB: predicated region body
PF: predicated region fallthrough
CT: control target
= control target key end

     0   :  { %8 = vsyncpa [#allocation3], 0  ;;  %s1435_s0 = inlined_call_operand.hbm [shape: f32[2,32,256], index: 0, kind: input, shape index: {}]   ;;  %s1436_s1 = inlined_call_operand.hbm [shape: f32[32,30], index: 1, kind: input, shape index: {}]   ;;  %s1437_s2 = inlined_call_operand.vmem [shape: f32[1,30], index: 2, kind: input, shape index: {}]   ;;  %s1438_s3 = inlined_call_operand.vmem [shape: f32[2,256,30], index: 3, kind: output, shape index: {}]  }
   0x1   :  { %10 = vsyncpa [#allocation3 + $0x1], 0 }
   0x2   :  { %11 = vsyncpa [#allocation5], 0  ;;  %s1142_s12 = smov 0   ;;  %s1144_s13 = smov 0  }
   0x3   :  { %s1146_s14 = smov 0   ;;  %s1148_s15 = smov 0  }
   0x4   :  { %s1150_s16 = smov 0   ;;  %s1152_s17 = smov 0  }
   0x5 LB: > { %s777_s18 = sadd.s32 4294967295, %s1114_s17   ;;  %p51_p0 = scmp.ne.s32.totalorder %s1098_s13, %s1094_s12  ;;  %s1114_s17 = sphi %s1152_s17, %s17_s17   ;;  %s1110_s16 = sphi %s1150_s16, %s1455_s16   ;;  %s1106_s15 = sphi %s1148_s15, %s1454_s15   ;;  %s1102_s14 = sphi %s1146_s14, %s1453_s14   ;;  %s1098_s13 = sphi %s1144_s13, %s1452_s13   ;;  %s1094_s12 = sphi %s1142_s12, %s1451_s12  }
   0x6   : > { %p1172_p1 = scmp.eq.s32.totalorder %s777_s18, 0  ;;  %p779_p2 = scmp.ge.s32.totalorder %s1114_s17, 1 }
   0x7   : > { %p132_p3 = scmp.lt.s32.totalorder %s1114_s17, 3  ;;  %s1116_s22 = smov [#allocation4]  }
   0x8   : > { %s1443_s19 = scalar_select %p1172_p1, 1, 0 }
   0x9   : > { %p1180_p4 = por %p1172_p1, %p51_p0  ;;  %p1184_p5 = pnand %p779_p2, %p132_p3 }
   0xa   : > { %s144_s23 = sshll.u32 %s1116_s22, 4  ;;  %s29_s25 = sadd.s32 1, %s1110_s16  ;;  %s145_s23 = int_to_ptr.vmem [resolvable:$true] %s144_s23 }
   0xb   : > { %s1444_s20 = scalar_select %p1180_p4, 1, 0 }
   0xc   : > { %s1445_s21 = scalar_select %p1184_p5, 1, 0 }
   0xd   : > { %p937_p6 = pneg %p1184_p5  ;;  %s1002_s28 = scalar_lea.hbm %s1436_s1, 512 }
   0xe   : > { %p1003_p8 = scmp.ne.s32.totalorder %s1436_s1, %s1002_s28  ;;  %p1009_p12 = scmp.lt.u32.totalorder %s1002_s28, %s1436_s1 }
   0xf   : > { %p1192_p7 = pnand %p937_p6, %p1172_p1 }
  0x11   : > { %p1004_p9 = pneg %p1192_p7 }
  0x13   : > { %p1005_p10 = pnand %p1004_p9, %p1003_p8 }
  0x15   : > { %p1006_p11 = pneg %p1005_p10 }
  0x17   : > { %p1011_p13 = pnand %p1009_p12, %p1006_p11 }
  0x19   : > { %1014 = shalt.err (!%p1011_p13)
}
  0x1a   : > { %s1015_s6 = scalar_lea.vmem %s145_s23, 512  ;;  %p1023_p6 = scmp.lt.s32.totalorder %s145_s23, %s145_s23 }
  0x1b   : > { %p1016_p0 = scmp.ne.s32.totalorder %s145_s23, %s1015_s6  ;;  %p1024_p1 = scmp.lt.s32.totalorder %s1015_s6, %s1015_s6 }
  0x1d   : > { %p1018_p2 = pnand %p1016_p0, %p1004_p9  ;;  %p1025_p4 = por %p1024_p1, %p1023_p6 }
  0x1f   : > { %p1019_p3 = pneg %p1018_p2 }
  0x21   : > { %p1026_p5 = pnand %p1025_p4, %p1019_p3 }
  0x23   : > { %1029 = shalt.err (!%p1026_p5)
}
  0x24   : > { %s1117_s7 = smov 128   ;;  %s1118_s8 = smov 8  }
  0x25   : > { %940 = dma.hbm_to_vmem [thread:$0]  (!%p1192_p7), %s1436_s1, 512, %s145_s23, [#allocation5], %s1117_s7, %s1117_s7, %s1118_s8  }
  0x26   : > { %p31_p1 = scmp.ge.s32.totalorder %s29_s25, 2  ;;  %s38_s11 = sadd.s32 1, %s1102_s14 }
  0x27   : > { %p45_p4 = scmp.ne.s32.totalorder %s1102_s14, %s1098_s13  ;;  %p46_p5 = scmp.eq.s32.totalorder %s1114_s17, 0 }
  0x28   : > { %s1457_s25 = smov (%p31_p1, %s29_s25), 0  ;;  %p946_p9 = scmp.lt.s32.totalorder %s1114_s17, 2 }
  0x29   : > { %p47_p8 = por %p46_p5, %p45_p4  ;;  %s33_s12 = ssub.s32 %s1110_s16, %s1457_s25 }
  0x2a   : > { %s161_s18 = sand.u32 1, %s1102_s14   ;;  %p36_p10 = scmp.eq.s32.totalorder %s33_s12, 0 }
  0x2b   : > { %s782_s22 = sshll.u32 %s161_s18, 6  ;;  %s825_s26 = sshll.u32 %s1110_s16, 10 }
  0x2c   : > { %s1225_s27 = scalar_select %p36_p10, %s1102_s14, %s38_s11  }
  0x2d   : > { %s1230_s23 = scalar_lea.hbm %s1435_s0, %s825_s26  ;;  %s165_s29 = scalar_lea.vmem [#allocation2], %s782_s22 }
  0x2e   : > { %s174_s30 = sshll.u32 %s165_s29, 4  ;;  %p1232_p7 = pnand %p946_p9, %p47_p8  ;;  %s1236_s30 = int_to_ptr.vmem [resolvable:$true] %s174_s30 }
  0x2f   : > { %s1238_s5 = scalar_lea.sflag [#allocation3], %s161_s18  ;;  %s1030_s6 = scalar_lea.hbm %s1230_s23, 1024 }
  0x30   : > { %p1031_p11 = scmp.ne.s32.totalorder %s1230_s23, %s1030_s6  ;;  %p1032_p12 = pneg %p1232_p7 }
  0x31   : > { %s1035_s9 = scalar_lea.hbm %s1435_s0, 2048  ;;  %p1036_p2 = scmp.lt.u32.totalorder %s1230_s23, %s1435_s0 }
  0x32   : > { %p1033_p13 = pnand %p1032_p12, %p1031_p11  ;;  %p1037_p3 = scmp.lt.u32.totalorder %s1035_s9, %s1030_s6 }
  0x33   : > { %p1039_p1 = scmp.lt.u32.totalorder %s1030_s6, %s1230_s23 }
  0x34   : > { %p1034_p0 = pneg %p1033_p13  ;;  %p1038_p6 = por %p1037_p3, %p1036_p2 }
  0x36   : > { %p1040_p4 = por %p1039_p1, %p1038_p6 }
  0x38   : > { %p1041_p5 = pnand %p1040_p4, %p1034_p0 }
  0x3a   : > { %1044 = shalt.err (!%p1041_p5)
}
  0x3b   : > { %s1045_s12 = scalar_lea.vmem %s1236_s30, 1024  ;;  %s1119_s18 = smov [#allocation2]  }
  0x3c   : > { %p1046_p8 = scmp.ne.s32.totalorder %s1236_s30, %s1045_s12  ;;  %s1050_s22 = sshll.u32 %s1119_s18, 4  ;;  %s1051_s22 = int_to_ptr.vmem [resolvable:$false] %s1050_s22 }
  0x3d   : > { %s1052_s26 = scalar_lea.vmem %s1051_s22, 2048  ;;  %p1053_p11 = scmp.lt.s32.totalorder %s1236_s30, %s1051_s22 }
  0x3e   : > { %p1048_p9 = pnand %p1046_p8, %p1032_p12  ;;  %p1054_p13 = scmp.lt.s32.totalorder %s1052_s26, %s1045_s12 }
  0x40   : > { %p1049_p10 = pneg %p1048_p9  ;;  %p1055_p2 = por %p1054_p13, %p1053_p11 }
  0x42   : > { %p1056_p3 = pnand %p1055_p2, %p1049_p10 }
  0x44   : > { %1059 = shalt.err (!%p1056_p3)
}
  0x45   : > { %s1120_s24 = smov 256   ;;  %s1121_s28 = smov 16  }
  0x46   : > { %944 = dma.hbm_to_vmem [thread:$0]  (!%p1232_p7), %s1230_s23, 1024, %s1236_s30, %s1238_s5, %s1120_s24, %s1120_s24, %s1121_s28  }
  0x47   : > { %p1448_p12 = scmp.ne.s32.totalorder %s1445_s21, 0 }
  0x48   : > { %s188_s29 = sand.u32 (!%p1448_p12), 1, %s1098_s13   ;;  %p1449_p0 = scmp.ne.s32.totalorder (!%p1448_p12), %s1444_s20, 0 }
  0x49   : > { %186 = sbr.rel (%p1448_p12) target bundleno = 490 (0x1ea), region = 32  ;;  %s786_s6 = sshll.u32 (!%p1448_p12), %s188_s29, 6 }
  0x4a   : > { %s189_s7 = scalar_lea.sflag (!%p1448_p12), [#allocation3], %s188_s29  ;;  %s192_s8 = scalar_lea.vmem (!%p1448_p12), [#allocation2], %s786_s6 }
  0x50   : > { %1085 = dma.done.wait (%p1449_p0), %s189_s7, 1024  }
  0x51   : > { %1087 = vsyncadd (%p1449_p0), %s189_s7, 4294966272  ;;  %p1450_p6 = scmp.ne.s32.totalorder %s1443_s19, 0 }
  0x53   : > { %1089 = dma.done.wait (%p1450_p6), [#allocation5], 512  }
  0x54   : > { %1091 = vsyncadd (%p1450_p6), [#allocation5], 4294966784  ;;  %v235_v0 = vld [vmem:[%s192_s8 + $0x8] sm:$0xff]  ;;  %v234_v1 = vld [vmem:[%s192_s8] sm:$0xff]  ;;  %vm317_vm0 = vcmask 261120   ;;  %p225_p7 = scmp.lt.s32.totalorder %s1106_s15, 1 }
  0x55   : > { %285 = vxpose.xlu1.b32.start [1/4] (short) %v235_v0, 128  ;;  %253 = vxpose.xlu0.b32.start [1/4] (short) %v234_v1, 128  ;;  %v237_v2 = vld [vmem:[%s192_s8 + $0x18] sm:$0xff]  ;;  %v236_v3 = vld [vmem:[%s192_s8 + $0x10] sm:$0xff]  ;;  %v242_v4 = vld [vmem:[#allocation4] sm:$0xff]  ;;  %vm639_vm1 = vcmask 244736  }
  0x56   : > { %v243_v5 = vld [vmem:[#allocation4 + $0x8] sm:$0xff]  ;;  %v244_v6 = vld [vmem:[#allocation4 + $0x10] sm:$0xff]  ;;  %v245_v7 = vld [vmem:[#allocation4 + $0x18] sm:$0xff]  ;;  %s1459_s15 = smov (!%p225_p7, %s1106_s15), 1 }
  0x57   : > { %v919_v8 = vpack.c.bf16 %v243_v5, %v242_v4  ;;  %v923_v9 = vpack.c.bf16 %v245_v7, %v244_v6  ;;  %v239_v10 = vld [vmem:[%s192_s8 + $0x28] sm:$0xff]  ;;  %v238_v11 = vld [vmem:[%s192_s8 + $0x20] sm:$0xff]  ;;  %v241_v12 = vld [vmem:[%s192_s8 + $0x38] sm:$0xff]  ;;  %s826_s19 = sshll.u32 %s1459_s15, 8 }
  0x58   : > { %v240_v13 = vld [vmem:[%s192_s8 + $0x30] sm:$0xff]  ;;  %v1314_v46 = vld [vmem:[%s1437_s2] ss:$0 sm:$0xff]  ;;  %s1319_s4 = scalar_lea.vmem %s1438_s3, %s826_s19 }
  0x59   : > { %286 = vxpose.xlu1.b32.cont [2/4] (short) %v237_v2, 128  ;;  %254 = vxpose.xlu0.b32.cont [2/4] (short) %v236_v3, 128 }
  0x5a   : > { %920 = vmatprep.subr.bf16.mxu0 %v919_v8  ;;  %927 = vmatprep.subr.bf16.mxu1 %v919_v8 }
  0x5b   : > { %922 = vmatpush3.bf16.msra.mxu0 %v919_v8  ;;  %929 = vmatpush3.bf16.msra.mxu1 %v919_v8 }
  0x5c   : > { %924 = vmatprep.subr.bf16.mxu0 %v923_v9  ;;  %928 = vmatprep.subr.bf16.mxu1 %v923_v9 }
  0x5d   : > { %287 = vxpose.xlu1.b32.cont [3/4] (short) %v239_v10, 128  ;;  %255 = vxpose.xlu0.b32.cont [3/4] (short) %v238_v11, 128 }
  0x5f   : > { %926 = vmatpush3.bf16.msra.mxu0 %v923_v9  ;;  %930 = vmatpush3.bf16.msra.mxu1 %v923_v9 }
  0x61   : > { %288 = vxpose.xlu1.b32.end [4/4] (short) %v241_v12, 128  ;;  %256 = vxpose.xlu0.b32.end [4/4] (short) %v240_v13, 128 }
  0xd5   : > { %v301_v14 = vpop.trf.xlu1  ;;  %v269_v15 = vpop.trf.xlu0 }
  0xd6   : > { %871 = vmatprep.mubr.msk.f32.mxu0 %vm317_vm0, %v269_v15  ;;  %895 = vmatprep.mubr.msk.f32.mxu1 %vm317_vm0, %v301_v14 }
  0xd9   : > { %v302_v16 = vpop.trf.xlu1  ;;  %v270_v17 = vpop.trf.xlu0 }
  0xda   : > { %872 = vmatmul.mubr.msk.f32.vlgmr.msra.gmra.mrb[0].mxu0 %vm317_vm0, %v270_v17  ;;  %896 = vmatmul.mubr.msk.f32.vlgmr.msra.gmra.mrb[0].mxu1 %vm317_vm0, %v302_v16 }
  0xdd   : > { %v303_v18 = vpop.trf.xlu1  ;;  %v271_v19 = vpop.trf.xlu0 }
  0xde   : > { %874 = vmatprep.mubr.msk.f32.mxu0 %vm317_vm0, %v271_v19  ;;  %898 = vmatprep.mubr.msk.f32.mxu1 %vm317_vm0, %v303_v18 }
  0xe1   : > { %v304_v20 = vpop.trf.xlu1  ;;  %v272_v21 = vpop.trf.xlu0 }
  0xe2   : > { %875 = vmatmul.mubr.msk.f32.gmra.mrb[2].mxu0 %vm317_vm0, %v272_v21  ;;  %899 = vmatmul.mubr.msk.f32.gmra.mrb[2].mxu1 %vm317_vm0, %v304_v20 }
  0xe5   : > { %v305_v22 = vpop.trf.xlu1  ;;  %v273_v23 = vpop.trf.xlu0 }
  0xe6   : > { %877 = vmatprep.mubr.msk.f32.mxu0 %vm317_vm0, %v273_v23  ;;  %901 = vmatprep.mubr.msk.f32.mxu1 %vm317_vm0, %v305_v22 }
  0xe9   : > { %v306_v24 = vpop.trf.xlu1  ;;  %v274_v25 = vpop.trf.xlu0 }
  0xea   : > { %878 = vmatmul.mubr.msk.f32.gmra.mrb[4].mxu0 %vm317_vm0, %v274_v25  ;;  %902 = vmatmul.mubr.msk.f32.gmra.mrb[4].mxu1 %vm317_vm0, %v306_v24 }
  0xed   : > { %v307_v26 = vpop.trf.xlu1  ;;  %v275_v27 = vpop.trf.xlu0 }
  0xee   : > { %880 = vmatprep.mubr.msk.f32.mxu0 %vm317_vm0, %v275_v27  ;;  %904 = vmatprep.mubr.msk.f32.mxu1 %vm317_vm0, %v307_v26 }
  0xf1   : > { %v308_v28 = vpop.trf.xlu1  ;;  %v276_v29 = vpop.trf.xlu0 }
  0xf2   : > { %881 = vmatmul.mubr.msk.f32.gmra.mrb[6].mxu0 %vm317_vm0, %v276_v29  ;;  %905 = vmatmul.mubr.msk.f32.gmra.mrb[6].mxu1 %vm317_vm0, %v308_v28 }
  0xf5   : > { %v309_v30 = vpop.trf.xlu1  ;;  %v277_v31 = vpop.trf.xlu0 }
  0xf6   : > { %883 = vmatprep.mubr.msk.f32.mxu0 %vm317_vm0, %v277_v31  ;;  %907 = vmatprep.mubr.msk.f32.mxu1 %vm317_vm0, %v309_v30 }
  0xf9   : > { %v310_v32 = vpop.trf.xlu1  ;;  %v278_v33 = vpop.trf.xlu0 }
  0xfa   : > { %884 = vmatmul.mubr.msk.f32.gmra.mrb[8].mxu0 %vm317_vm0, %v278_v33  ;;  %908 = vmatmul.mubr.msk.f32.gmra.mrb[8].mxu1 %vm317_vm0, %v310_v32 }
  0xfd   : > { %v311_v34 = vpop.trf.xlu1  ;;  %v279_v35 = vpop.trf.xlu0 }
  0xfe   : > { %886 = vmatprep.mubr.msk.f32.mxu0 %vm317_vm0, %v279_v35  ;;  %910 = vmatprep.mubr.msk.f32.mxu1 %vm317_vm0, %v311_v34 }
 0x101   : > { %v312_v36 = vpop.trf.xlu1  ;;  %v280_v37 = vpop.trf.xlu0 }
 0x102   : > { %887 = vmatmul.mubr.msk.f32.gmra.mrb[10].mxu0 %vm317_vm0, %v280_v37  ;;  %911 = vmatmul.mubr.msk.f32.gmra.mrb[10].mxu1 %vm317_vm0, %v312_v36 }
 0x105   : > { %v313_v38 = vpop.trf.xlu1  ;;  %v281_v39 = vpop.trf.xlu0 }
 0x106   : > { %889 = vmatprep.mubr.msk.f32.mxu0 %vm317_vm0, %v281_v39  ;;  %913 = vmatprep.mubr.msk.f32.mxu1 %vm317_vm0, %v313_v38 }
 0x109   : > { %v314_v40 = vpop.trf.xlu1  ;;  %v282_v41 = vpop.trf.xlu0 }
 0x10a   : > { %890 = vmatmul.mubr.msk.f32.gmra.mrb[12].mxu0 %vm317_vm0, %v282_v41  ;;  %914 = vmatmul.mubr.msk.f32.gmra.mrb[12].mxu1 %vm317_vm0, %v314_v40 }
 0x10d   : > { %v315_v42 = vpop.trf.xlu1  ;;  %v283_v43 = vpop.trf.xlu0 }
 0x10e   : > { %892 = vmatprep.mubr.msk.f32.mxu0 %vm317_vm0, %v283_v43  ;;  %916 = vmatprep.mubr.msk.f32.mxu1 %vm317_vm0, %v315_v42 }
 0x111   : > { %v316_v44 = vpop.trf.xlu1  ;;  %v284_v45 = vpop.trf.xlu0 }
 0x112   : > { %893 = vmatmul.mubr.msk.f32.gmra.mrb[14].mxu0 %vm317_vm0, %v284_v45  ;;  %917 = vmatmul.mubr.msk.f32.gmra.mrb[14].mxu1 %vm317_vm0, %v316_v44 }
 0x1ad   : > { %v873_v47 = vpop.f32.mrb[0].mxu0  ;;  %v897_v48 = vpop.f32.mrb[0].mxu1 }
 0x1ae   : > { %v486_v49 = vadd.f32 %v873_v47, %v1314_v46  ;;  %v566_v50 = vadd.f32 %v897_v48, %v1314_v46  ;;  %v480_v51 = vpop.f32.mrb[1].mxu0  ;;  %v560_v52 = vpop.f32.mrb[1].mxu1 }
 0x1af   : > { %v481_v53 = vadd.f32 %v1314_v46, %v480_v51  ;;  %v561_v54 = vadd.f32 %v1314_v46, %v560_v52 }
 0x1b0   : > { %641 = vst.msk [vmem:[%s1319_s4 + $0x8] sm:$0xff] %vm639_vm1, %v486_v49  ;;  %657 = vst.msk [vmem:[%s1319_s4 + $0x88] sm:$0xff] %vm639_vm1, %v566_v50 }
 0x1b1   : > { %640 = vst.msk [vmem:[%s1319_s4] sm:$0xff] %vm639_vm1, %v481_v53  ;;  %656 = vst.msk [vmem:[%s1319_s4 + $0x80] sm:$0xff] %vm639_vm1, %v561_v54 }
 0x1b5   : > { %v876_v55 = vpop.f32.mrb[2].mxu0  ;;  %v900_v56 = vpop.f32.mrb[2].mxu1 }
 0x1b6   : > { %v496_v57 = vadd.f32 %v876_v55, %v1314_v46  ;;  %v576_v58 = vadd.f32 %v900_v56, %v1314_v46  ;;  %v490_v59 = vpop.f32.mrb[3].mxu0  ;;  %v570_v60 = vpop.f32.mrb[3].mxu1 }
 0x1b7   : > { %v491_v61 = vadd.f32 %v1314_v46, %v490_v59  ;;  %v571_v62 = vadd.f32 %v1314_v46, %v570_v60 }
 0x1b8   : > { %643 = vst.msk [vmem:[%s1319_s4 + $0x18] sm:$0xff] %vm639_vm1, %v496_v57  ;;  %659 = vst.msk [vmem:[%s1319_s4 + $0x98] sm:$0xff] %vm639_vm1, %v576_v58 }
 0x1b9   : > { %642 = vst.msk [vmem:[%s1319_s4 + $0x10] sm:$0xff] %vm639_vm1, %v491_v61  ;;  %658 = vst.msk [vmem:[%s1319_s4 + $0x90] sm:$0xff] %vm639_vm1, %v571_v62 }
 0x1bd   : > { %v879_v63 = vpop.f32.mrb[4].mxu0  ;;  %v903_v0 = vpop.f32.mrb[4].mxu1 }
 0x1be   : > { %v506_v1 = vadd.f32 %v879_v63, %v1314_v46  ;;  %v586_v2 = vadd.f32 %v903_v0, %v1314_v46  ;;  %v500_v3 = vpop.f32.mrb[5].mxu0  ;;  %v580_v4 = vpop.f32.mrb[5].mxu1 }
 0x1bf   : > { %v501_v5 = vadd.f32 %v1314_v46, %v500_v3  ;;  %v581_v6 = vadd.f32 %v1314_v46, %v580_v4 }
 0x1c0   : > { %645 = vst.msk [vmem:[%s1319_s4 + $0x28] sm:$0xff] %vm639_vm1, %v506_v1  ;;  %661 = vst.msk [vmem:[%s1319_s4 + $0xa8] sm:$0xff] %vm639_vm1, %v586_v2 }
 0x1c1   : > { %644 = vst.msk [vmem:[%s1319_s4 + $0x20] sm:$0xff] %vm639_vm1, %v501_v5  ;;  %660 = vst.msk [vmem:[%s1319_s4 + $0xa0] sm:$0xff] %vm639_vm1, %v581_v6 }
 0x1c5   : > { %v882_v7 = vpop.f32.mrb[6].mxu0  ;;  %v906_v8 = vpop.f32.mrb[6].mxu1 }
 0x1c6   : > { %v516_v9 = vadd.f32 %v882_v7, %v1314_v46  ;;  %v596_v10 = vadd.f32 %v906_v8, %v1314_v46  ;;  %v510_v11 = vpop.f32.mrb[7].mxu0  ;;  %v590_v12 = vpop.f32.mrb[7].mxu1 }
 0x1c7   : > { %v511_v13 = vadd.f32 %v1314_v46, %v510_v11  ;;  %v591_v14 = vadd.f32 %v1314_v46, %v590_v12 }
 0x1c8   : > { %647 = vst.msk [vmem:[%s1319_s4 + $0x38] sm:$0xff] %vm639_vm1, %v516_v9  ;;  %663 = vst.msk [vmem:[%s1319_s4 + $0xb8] sm:$0xff] %vm639_vm1, %v596_v10 }
 0x1c9   : > { %646 = vst.msk [vmem:[%s1319_s4 + $0x30] sm:$0xff] %vm639_vm1, %v511_v13  ;;  %662 = vst.msk [vmem:[%s1319_s4 + $0xb0] sm:$0xff] %vm639_vm1, %v591_v14 }
 0x1cd   : > { %v885_v15 = vpop.f32.mrb[8].mxu0  ;;  %v909_v16 = vpop.f32.mrb[8].mxu1 }
 0x1ce   : > { %v526_v17 = vadd.f32 %v885_v15, %v1314_v46  ;;  %v606_v18 = vadd.f32 %v909_v16, %v1314_v46  ;;  %v520_v19 = vpop.f32.mrb[9].mxu0  ;;  %v600_v20 = vpop.f32.mrb[9].mxu1 }
 0x1cf   : > { %v521_v21 = vadd.f32 %v1314_v46, %v520_v19  ;;  %v601_v22 = vadd.f32 %v1314_v46, %v600_v20 }
 0x1d0   : > { %649 = vst.msk [vmem:[%s1319_s4 + $0x48] sm:$0xff] %vm639_vm1, %v526_v17  ;;  %665 = vst.msk [vmem:[%s1319_s4 + $0xc8] sm:$0xff] %vm639_vm1, %v606_v18 }
 0x1d1   : > { %648 = vst.msk [vmem:[%s1319_s4 + $0x40] sm:$0xff] %vm639_vm1, %v521_v21  ;;  %664 = vst.msk [vmem:[%s1319_s4 + $0xc0] sm:$0xff] %vm639_vm1, %v601_v22 }
 0x1d5   : > { %v888_v23 = vpop.f32.mrb[10].mxu0  ;;  %v912_v24 = vpop.f32.mrb[10].mxu1 }
 0x1d6   : > { %v536_v25 = vadd.f32 %v888_v23, %v1314_v46  ;;  %v616_v26 = vadd.f32 %v912_v24, %v1314_v46  ;;  %v530_v27 = vpop.f32.mrb[11].mxu0  ;;  %v610_v28 = vpop.f32.mrb[11].mxu1 }
 0x1d7   : > { %v531_v29 = vadd.f32 %v1314_v46, %v530_v27  ;;  %v611_v30 = vadd.f32 %v1314_v46, %v610_v28 }
 0x1d8   : > { %651 = vst.msk [vmem:[%s1319_s4 + $0x58] sm:$0xff] %vm639_vm1, %v536_v25  ;;  %667 = vst.msk [vmem:[%s1319_s4 + $0xd8] sm:$0xff] %vm639_vm1, %v616_v26 }
 0x1d9   : > { %650 = vst.msk [vmem:[%s1319_s4 + $0x50] sm:$0xff] %vm639_vm1, %v531_v29  ;;  %666 = vst.msk [vmem:[%s1319_s4 + $0xd0] sm:$0xff] %vm639_vm1, %v611_v30 }
 0x1dd   : > { %v891_v31 = vpop.f32.mrb[12].mxu0  ;;  %v915_v32 = vpop.f32.mrb[12].mxu1 }
 0x1de   : > { %v546_v33 = vadd.f32 %v891_v31, %v1314_v46  ;;  %v626_v34 = vadd.f32 %v915_v32, %v1314_v46  ;;  %v540_v35 = vpop.f32.mrb[13].mxu0  ;;  %v620_v36 = vpop.f32.mrb[13].mxu1 }
 0x1df   : > { %v541_v37 = vadd.f32 %v1314_v46, %v540_v35  ;;  %v621_v38 = vadd.f32 %v1314_v46, %v620_v36 }
 0x1e0   : > { %653 = vst.msk [vmem:[%s1319_s4 + $0x68] sm:$0xff] %vm639_vm1, %v546_v33  ;;  %669 = vst.msk [vmem:[%s1319_s4 + $0xe8] sm:$0xff] %vm639_vm1, %v626_v34 }
 0x1e1   : > { %652 = vst.msk [vmem:[%s1319_s4 + $0x60] sm:$0xff] %vm639_vm1, %v541_v37  ;;  %668 = vst.msk [vmem:[%s1319_s4 + $0xe0] sm:$0xff] %vm639_vm1, %v621_v38 }
 0x1e5   : > { %v894_v39 = vpop.f32.mrb[14].mxu0  ;;  %v918_v40 = vpop.f32.mrb[14].mxu1 }
 0x1e6   : > { %v556_v41 = vadd.f32 %v894_v39, %v1314_v46  ;;  %v636_v42 = vadd.f32 %v918_v40, %v1314_v46  ;;  %v550_v43 = vpop.f32.mrb[15].mxu0  ;;  %v630_v44 = vpop.f32.mrb[15].mxu1 }
 0x1e7   : > { %v551_v45 = vadd.f32 %v1314_v46, %v550_v43  ;;  %v631_v47 = vadd.f32 %v1314_v46, %v630_v44 }
 0x1e8   : > { %655 = vst.msk [vmem:[%s1319_s4 + $0x78] sm:$0xff] %vm639_vm1, %v556_v41  ;;  %671 = vst.msk [vmem:[%s1319_s4 + $0xf8] sm:$0xff] %vm639_vm1, %v636_v42 }
 0x1e9   : > { %654 = vst.msk [vmem:[%s1319_s4 + $0x70] sm:$0xff] %vm639_vm1, %v551_v45  ;;  %670 = vst.msk [vmem:[%s1319_s4 + $0xf0] sm:$0xff] %vm639_vm1, %v631_v47 }
 0x1ea PF: > { %s17_s17 = sadd.s32 1, %s1114_s17   ;;  %s1451_s12 = smov %s1098_s13 }
 0x1eb   : > { %p14_p1 = scmp.ge.s32.totalorder %s17_s17, 4   ;;  %s1452_s13 = smov %s1102_s14 }
 0x1ec   : > { %s1453_s14 = smov %s1225_s27  ;;  %s1454_s15 = smov %s1110_s16 }
 0x1ed   : > { %s1455_s16 = smov %s1457_s25  ;;  %16 = sbr.rel (!%p14_p1) target bundleno = 5 (0x5), region = 76 }
 0x1f4   :  { %702 = vsyncpa [#allocation3], 1 }
 0x1f5   :  { %704 = vsyncpa [#allocation3 + $0x1], 1 }
 0x1f6   :  { %705 = vsyncpa [#allocation5], 1 }

</bundles_post_ra>
